<compile_context>
chip_gen: v7x
topology: tpu7x:2x2x1
jax: 0.10.0
libtpu: 0.0.40
codegen_flags: <defaults>
</compile_context>

<pallas_src>
import jax
import jax.numpy as jnp
import numpy as np
from jax.experimental import pallas as pl
from jax.experimental.pallas import tpu as pltpu

ET_NORMALIZE_COEF = 1000.0  # configs.et_normalize_coef
BN_EPS = 1e-5
NEG_BIG = -1e30  # finite stand-in for -inf (avoids 0/0 NaN when a row is fully masked)


def _make_kernel(B, n_m, H):
    inv_nm = 1.0 / float(n_m)

    def kernel(mt_ref, an_ref, hx_ref, mask_ref,
               w2_ref, gamma_ref, beta_ref,
               w1a_ref, w1b_ref, w1c_ref, b1_ref,
               wm_ref, bm_ref, w3t_ref, b3_ref,
               sel_ref, exp_ref, q_ref,
               pi_ref, pool_ref):
        # --- fc2 (Linear(2, H), no bias); 1/et_normalize_coef already folded into w2 ---
        w2 = w2_ref[...]                                   # (2, H)
        h = mt_ref[...] * w2[0:1, :] + an_ref[...] * w2[1:2, :]   # (N, H)

        # --- BatchNorm1d(H), training-mode batch statistics (two-pass, torch parity) ---
        mean = jnp.mean(h, axis=0, keepdims=True)          # (1, H)
        centered = h - mean                                # computed once, reused
        var = jnp.mean(centered * centered, axis=0, keepdims=True)
        hn = centered * jax.lax.rsqrt(var + BN_EPS)
        hn = hn * gamma_ref[...] + beta_ref[...]           # (N, H)

        sel = sel_ref[...]                                 # (B, N)
        exp_m = exp_ref[...]                               # (N, B)
        q = q_ref[...]                                     # (N, n_m)

        # --- pool over machines of each batch element: one MXU op, dense (B,H) store ---
        pool = jnp.dot(sel, hn, preferred_element_type=jnp.float32) * inv_nm   # (B, H)
        pool_ref[...] = pool

        # --- actor layer 1: concat([hn, pool_rep, hx_rep]) @ W1 (W1 split by input block)
        pb = (jnp.dot(pool, w1b_ref[...], preferred_element_type=jnp.float32)
              + jnp.dot(hx_ref[...], w1c_ref[...], preferred_element_type=jnp.float32))  # (B, H)
        z = (jnp.dot(hn, w1a_ref[...], preferred_element_type=jnp.float32)
             + jnp.dot(exp_m, pb, preferred_element_type=jnp.float32)   # broadcast to rows
             + b1_ref[...])                                             # (N, H)
        a1 = jnp.tanh(z)

        # --- actor layer 2 ---
        a2 = jnp.tanh(jnp.dot(a1, wm_ref[...], preferred_element_type=jnp.float32)
                      + bm_ref[...])                                    # (N, H)

        # --- actor layer 3 -> per-row score, gathered into lane-dense (B, n_m) via MXU ---
        s_col = (jnp.dot(a2, w3t_ref[...], preferred_element_type=jnp.float32)
                 + b3_ref[...]) * 10.0                                  # (N, 1)
        s_bn = jnp.dot(sel, s_col * q, preferred_element_type=jnp.float32)   # (B, n_m)

        # --- masked softmax over the lane axis (all batch rows at once) ---
        s_bn = jnp.where(mask_ref[...] > 0.5, NEG_BIG, s_bn)
        mx = jnp.max(s_bn, axis=-1, keepdims=True)
        e = jnp.exp(s_bn - mx)
        denom = jnp.sum(e, axis=-1, keepdims=True)
        pi_ref[...] = e / denom                                          # dense (B, n_m) store

    return kernel


def mch_actor_forward(params, action_node, hx, mask_mch_action, mch_time):
    """Pallas version of Mch_Actor.forward. Returns (pi_mch, 0, pool)."""
    B, n_m = action_node.shape
    H = hx.shape[-1]
    N = B * n_m

    mt = jnp.asarray(mch_time, jnp.float32).reshape(N, 1)
    an = jnp.asarray(action_node, jnp.float32).reshape(N, 1)
    mask = jnp.asarray(mask_mch_action).reshape(B, n_m).astype(jnp.float32)
    hx = jnp.asarray(hx, jnp.float32)

    # Fold the 1/et_normalize_coef scaling into the fc2 weight (removes in-kernel divides).
    w2_scaled = params["w2"] * jnp.float32(1.0 / ET_NORMALIZE_COEF)
    w3t = params["w3"].T                                  # (H, 1)

    # Tiny constant selection / broadcast matrices (host-precomputed, f32).
    batch_of_row = np.arange(N) // n_m
    sel = (batch_of_row[None, :] == np.arange(B)[:, None]).astype(np.float32)        # (B, N)
    expm = np.ascontiguousarray(sel.T)                                                # (N, B)
    q = (np.arange(N)[:, None] % n_m == np.arange(n_m)[None, :]).astype(np.float32)  # (N, n_m)

    inputs = (mt, an, hx, mask,
              w2_scaled, params["gamma"], params["beta"],
              params["w1a"], params["w1b"], params["w1c"], params["b1"],
              params["wm"], params["bm"], w3t, params["b3"],
              jnp.asarray(sel), jnp.asarray(expm), jnp.asarray(q))

    kernel = _make_kernel(B, n_m, H)
    vmem = lambda: pl.BlockSpec(memory_space=pltpu.MemorySpace.VMEM)

    pi, pool = pl.pallas_call(
        kernel,
        out_shape=(jax.ShapeDtypeStruct((B, n_m), jnp.float32),
                   jax.ShapeDtypeStruct((B, H), jnp.float32)),
        in_specs=[vmem() for _ in inputs],
        out_specs=(vmem(), vmem()),
    )(*inputs)

    return pi, 0, pool


def _reference_forward(params, action_node, hx, mask_mch_action, mch_time):
    """Pure-JAX replica of the PyTorch forward (for validation)."""
    B, n_m = action_node.shape
    H = hx.shape[-1]
    mt = mch_time / ET_NORMALIZE_COEF
    an = action_node / ET_NORMALIZE_COEF
    feat = jnp.stack([mt, an], axis=-1)                       # (B, n_m, 2)
    h = jnp.einsum("bnk,kh->bnh", feat, params["w2"]).reshape(-1, H)
    mean = h.mean(0, keepdims=True)
    var = ((h - mean) ** 2).mean(0, keepdims=True)
    hn = (h - mean) / jnp.sqrt(var + BN_EPS) * params["gamma"] + params["beta"]
    hn = hn.reshape(B, n_m, H)
    pool = hn.mean(axis=1)                                    # (B, H)
    pool_rep = jnp.broadcast_to(pool[:, None, :], (B, n_m, H))
    hx_rep = jnp.broadcast_to(hx[:, None, :], (B, n_m, H))
    w1 = jnp.concatenate([params["w1a"], params["w1b"], params["w1c"]], axis=0)  # (3H, H)
    c = jnp.concatenate([hn, pool_rep, hx_rep], axis=-1)      # (B, n_m, 3H)
    a1 = jnp.tanh(jnp.einsum("bnk,kh->bnh", c, w1) + params["b1"])
    a2 = jnp.tanh(jnp.einsum("bnk,kh->bnh", a1, params["wm"]) + params["bm"])
    s = (a2 * params["w3"]).sum(-1) + params["b3"][0, 0]
    s = s * 10.0
    mask = jnp.asarray(mask_mch_action).reshape(B, n_m).astype(bool)
    s = jnp.where(mask, -jnp.inf, s)
    pi = jax.nn.softmax(s, axis=1)
    return pi, 0, pool


def init_params(key, H):
    ks = jax.random.split(key, 8)

    def u(k, shape, fan_in):
        b = 1.0 / np.sqrt(fan_in)
        return jax.random.uniform(k, shape, jnp.float32, minval=-b, maxval=b)

    return {
        "w2": u(ks[0], (2, H), 2),          # fc2 weight (input-major)
        "gamma": jnp.ones((1, H), jnp.float32),
        "beta": jnp.zeros((1, H), jnp.float32),
        "w1a": u(ks[1], (H, H), 3 * H),     # actor layer1 weight, split over the 3H input
        "w1b": u(ks[2], (H, H), 3 * H),
        "w1c": u(ks[3], (H, H), 3 * H),
        "b1": u(ks[4], (1, H), 3 * H),
        "wm": u(ks[5], (H, H), H),          # actor layer2
        "bm": u(ks[6], (1, H), H),
        "w3": u(ks[7], (1, H), H),          # actor layer3 (output dim 1)
        "b3": jnp.zeros((1, 1), jnp.float32),
    }


if __name__ == "__main__":
    B, n_m, H = 2, 8, 32  # batch, machines, hidden_dim

    key = jax.random.PRNGKey(0)
    k_par, k_an, k_mt, k_hx, k_mask = jax.random.split(key, 5)

    params = init_params(k_par, H)

    action_node = jax.random.uniform(k_an, (B, n_m), jnp.float32) * 50.0
    mch_time = jax.random.uniform(k_mt, (B, n_m), jnp.float32) * 50.0
    hx = jax.random.normal(k_hx, (B, H), jnp.float32)
    mask_mch_action = jax.random.uniform(k_mask, (B, 1, n_m)) < 0.3
    mask_mch_action = mask_mch_action.at[:, :, 0].set(False)  # keep >=1 machine unmasked

    pi, v, pool = mch_actor_forward(params, action_node, hx, mask_mch_action, mch_time)
    jax.block_until_ready((pi, pool))

    pi_ref, _, pool_ref = _reference_forward(params, action_node, hx, mask_mch_action, mch_time)
    np.testing.assert_allclose(np.asarray(pi), np.asarray(pi_ref), rtol=1e-4, atol=1e-5)
    np.testing.assert_allclose(np.asarray(pool), np.asarray(pool_ref), rtol=1e-4, atol=1e-5)

    print("KERNEL_OK")
</pallas_src>

<mosaic_0001>
module attributes {stable_mosaic.version = 11 : i64} {
  func.func @kernel(%arg0: memref<16x1xf32, #tpu.memory_space<vmem>>, %arg1: memref<16x1xf32, #tpu.memory_space<vmem>>, %arg2: memref<2x32xf32, #tpu.memory_space<vmem>>, %arg3: memref<2x8xf32, #tpu.memory_space<vmem>>, %arg4: memref<2x32xf32, #tpu.memory_space<vmem>>, %arg5: memref<1x32xf32, #tpu.memory_space<vmem>>, %arg6: memref<1x32xf32, #tpu.memory_space<vmem>>, %arg7: memref<32x32xf32, #tpu.memory_space<vmem>>, %arg8: memref<32x32xf32, #tpu.memory_space<vmem>>, %arg9: memref<32x32xf32, #tpu.memory_space<vmem>>, %arg10: memref<1x32xf32, #tpu.memory_space<vmem>>, %arg11: memref<32x32xf32, #tpu.memory_space<vmem>>, %arg12: memref<1x32xf32, #tpu.memory_space<vmem>>, %arg13: memref<32x1xf32, #tpu.memory_space<vmem>>, %arg14: memref<1x1xf32, #tpu.memory_space<vmem>>, %arg15: memref<2x16xf32, #tpu.memory_space<vmem>>, %arg16: memref<16x2xf32, #tpu.memory_space<vmem>>, %arg17: memref<16x8xf32, #tpu.memory_space<vmem>>, %arg18: memref<2x8xf32, #tpu.memory_space<vmem>>, %arg19: memref<2x32xf32, #tpu.memory_space<vmem>>) attributes {dimension_semantics = [], scalar_prefetch = 0 : i64, scratch_operands = 0 : i64, tpu.core_type = #tpu.core_type<tc>} {
    %c0 = arith.constant 0 : index
    %c0_0 = arith.constant 0 : index
    %0 = vector.load %arg4[%c0, %c0_0] : memref<2x32xf32, #tpu.memory_space<vmem>>, vector<2x32xf32>
    %c0_1 = arith.constant 0 : index
    %c0_2 = arith.constant 0 : index
    %1 = vector.load %arg0[%c0_1, %c0_2] : memref<16x1xf32, #tpu.memory_space<vmem>>, vector<16x1xf32>
    %2 = vector.extract_strided_slice %0 {offsets = [0, 0], sizes = [1, 32], strides = [1, 1]} : vector<2x32xf32> to vector<1x32xf32>
    %3 = vector.broadcast %1 : vector<16x1xf32> to vector<16x32xf32>
    %4 = vector.broadcast %2 : vector<1x32xf32> to vector<16x32xf32>
    %5 = arith.mulf %3, %4 : vector<16x32xf32>
    %c0_3 = arith.constant 0 : index
    %c0_4 = arith.constant 0 : index
    %6 = vector.load %arg1[%c0_3, %c0_4] : memref<16x1xf32, #tpu.memory_space<vmem>>, vector<16x1xf32>
    %7 = vector.extract_strided_slice %0 {offsets = [1, 0], sizes = [1, 32], strides = [1, 1]} : vector<2x32xf32> to vector<1x32xf32>
    %8 = vector.broadcast %6 : vector<16x1xf32> to vector<16x32xf32>
    %9 = vector.broadcast %7 : vector<1x32xf32> to vector<16x32xf32>
    %10 = arith.mulf %8, %9 : vector<16x32xf32>
    %11 = arith.addf %5, %10 : vector<16x32xf32>
    %cst = arith.constant dense<0.000000e+00> : vector<32xf32>
    %12 = vector.multi_reduction <add>, %11, %cst [0] : vector<16x32xf32> to vector<32xf32>
    %13 = vector.shape_cast %12 : vector<32xf32> to vector<1x32xf32>
    %cst_5 = arith.constant 1.600000e+01 : f32
    %14 = vector.broadcast %cst_5 : f32 to vector<1x32xf32>
    %15 = arith.divf %13, %14 : vector<1x32xf32>
    %16 = vector.broadcast %15 : vector<1x32xf32> to vector<16x32xf32>
    %17 = arith.subf %11, %16 : vector<16x32xf32>
    %18 = arith.mulf %17, %17 : vector<16x32xf32>
    %cst_6 = arith.constant dense<0.000000e+00> : vector<32xf32>
    %19 = vector.multi_reduction <add>, %18, %cst_6 [0] : vector<16x32xf32> to vector<32xf32>
    %20 = vector.shape_cast %19 : vector<32xf32> to vector<1x32xf32>
    %cst_7 = arith.constant 1.600000e+01 : f32
    %21 = vector.broadcast %cst_7 : f32 to vector<1x32xf32>
    %22 = arith.divf %20, %21 : vector<1x32xf32>
    %cst_8 = arith.constant 9.99999974E-6 : f32
    %23 = vector.broadcast %cst_8 : f32 to vector<1x32xf32>
    %24 = arith.addf %22, %23 : vector<1x32xf32>
    %25 = math.rsqrt %24 : vector<1x32xf32>
    %26 = vector.broadcast %25 : vector<1x32xf32> to vector<16x32xf32>
    %27 = arith.mulf %17, %26 : vector<16x32xf32>
    %c0_9 = arith.constant 0 : index
    %c0_10 = arith.constant 0 : index
    %28 = vector.load %arg5[%c0_9, %c0_10] : memref<1x32xf32, #tpu.memory_space<vmem>>, vector<1x32xf32>
    %29 = vector.broadcast %28 : vector<1x32xf32> to vector<16x32xf32>
    %30 = arith.mulf %27, %29 : vector<16x32xf32>
    %c0_11 = arith.constant 0 : index
    %c0_12 = arith.constant 0 : index
    %31 = vector.load %arg6[%c0_11, %c0_12] : memref<1x32xf32, #tpu.memory_space<vmem>>, vector<1x32xf32>
    %32 = vector.broadcast %31 : vector<1x32xf32> to vector<16x32xf32>
    %33 = arith.addf %30, %32 : vector<16x32xf32>
    %c0_13 = arith.constant 0 : index
    %c0_14 = arith.constant 0 : index
    %34 = vector.load %arg15[%c0_13, %c0_14] : memref<2x16xf32, #tpu.memory_space<vmem>>, vector<2x16xf32>
    %c0_15 = arith.constant 0 : index
    %c0_16 = arith.constant 0 : index
    %35 = vector.load %arg16[%c0_15, %c0_16] : memref<16x2xf32, #tpu.memory_space<vmem>>, vector<16x2xf32>
    %c0_17 = arith.constant 0 : index
    %c0_18 = arith.constant 0 : index
    %36 = vector.load %arg17[%c0_17, %c0_18] : memref<16x8xf32, #tpu.memory_space<vmem>>, vector<16x8xf32>
    %cst_19 = arith.constant dense<0.000000e+00> : vector<2x32xf32>
    %37 = tpu.matmul %34, %33, %cst_19 {dimension_numbers = #tpu.dot_dimension_numbers<[1], [0], [0], [1], [0, 0, 1, 1], [], []>} : vector<2x16xf32>, vector<16x32xf32>, vector<2x32xf32> -> vector<2x32xf32>
    %cst_20 = arith.constant 1.250000e-01 : f32
    %38 = vector.broadcast %cst_20 : f32 to vector<2x32xf32>
    %39 = arith.mulf %37, %38 : vector<2x32xf32>
    %c0_21 = arith.constant 0 : index
    %c0_22 = arith.constant 0 : index
    %40 = vector.load %arg19[%c0_21, %c0_22] : memref<2x32xf32, #tpu.memory_space<vmem>>, vector<2x32xf32>
    tpu.vector_store %arg19[%c0_21, %c0_22], %39 {strides = array<i32>} : memref<2x32xf32, #tpu.memory_space<vmem>>, vector<2x32xf32>,
    %c0_23 = arith.constant 0 : index
    %c0_24 = arith.constant 0 : index
    %41 = vector.load %arg8[%c0_23, %c0_24] : memref<32x32xf32, #tpu.memory_space<vmem>>, vector<32x32xf32>
    %cst_25 = arith.constant dense<0.000000e+00> : vector<2x32xf32>
    %42 = tpu.matmul %39, %41, %cst_25 {dimension_numbers = #tpu.dot_dimension_numbers<[1], [0], [0], [1], [0, 0, 1, 1], [], []>} : vector<2x32xf32>, vector<32x32xf32>, vector<2x32xf32> -> vector<2x32xf32>
    %c0_26 = arith.constant 0 : index
    %c0_27 = arith.constant 0 : index
    %43 = vector.load %arg2[%c0_26, %c0_27] : memref<2x32xf32, #tpu.memory_space<vmem>>, vector<2x32xf32>
    %c0_28 = arith.constant 0 : index
    %c0_29 = arith.constant 0 : index
    %44 = vector.load %arg9[%c0_28, %c0_29] : memref<32x32xf32, #tpu.memory_space<vmem>>, vector<32x32xf32>
    %cst_30 = arith.constant dense<0.000000e+00> : vector<2x32xf32>
    %45 = tpu.matmul %43, %44, %cst_30 {dimension_numbers = #tpu.dot_dimension_numbers<[1], [0], [0], [1], [0, 0, 1, 1], [], []>} : vector<2x32xf32>, vector<32x32xf32>, vector<2x32xf32> -> vector<2x32xf32>
    %46 = arith.addf %42, %45 : vector<2x32xf32>
    %c0_31 = arith.constant 0 : index
    %c0_32 = arith.constant 0 : index
    %47 = vector.load %arg7[%c0_31, %c0_32] : memref<32x32xf32, #tpu.memory_space<vmem>>, vector<32x32xf32>
    %cst_33 = arith.constant dense<0.000000e+00> : vector<16x32xf32>
    %48 = tpu.matmul %33, %47, %cst_33 {dimension_numbers = #tpu.dot_dimension_numbers<[1], [0], [0], [1], [0, 0, 1, 1], [], []>} : vector<16x32xf32>, vector<32x32xf32>, vector<16x32xf32> -> vector<16x32xf32>
    %cst_34 = arith.constant dense<0.000000e+00> : vector<16x32xf32>
    %49 = tpu.matmul %35, %46, %cst_34 {dimension_numbers = #tpu.dot_dimension_numbers<[1], [0], [0], [1], [0, 0, 1, 1], [], []>} : vector<16x2xf32>, vector<2x32xf32>, vector<16x32xf32> -> vector<16x32xf32>
    %50 = arith.addf %48, %49 : vector<16x32xf32>
    %c0_35 = arith.constant 0 : index
    %c0_36 = arith.constant 0 : index
    %51 = vector.load %arg10[%c0_35, %c0_36] : memref<1x32xf32, #tpu.memory_space<vmem>>, vector<1x32xf32>
    %52 = vector.broadcast %51 : vector<1x32xf32> to vector<16x32xf32>
    %53 = arith.addf %50, %52 : vector<16x32xf32>
    %54 = math.tanh %53 : vector<16x32xf32>
    %c0_37 = arith.constant 0 : index
    %c0_38 = arith.constant 0 : index
    %55 = vector.load %arg11[%c0_37, %c0_38] : memref<32x32xf32, #tpu.memory_space<vmem>>, vector<32x32xf32>
    %cst_39 = arith.constant dense<0.000000e+00> : vector<16x32xf32>
    %56 = tpu.matmul %54, %55, %cst_39 {dimension_numbers = #tpu.dot_dimension_numbers<[1], [0], [0], [1], [0, 0, 1, 1], [], []>} : vector<16x32xf32>, vector<32x32xf32>, vector<16x32xf32> -> vector<16x32xf32>
    %c0_40 = arith.constant 0 : index
    %c0_41 = arith.constant 0 : index
    %57 = vector.load %arg12[%c0_40, %c0_41] : memref<1x32xf32, #tpu.memory_space<vmem>>, vector<1x32xf32>
    %58 = vector.broadcast %57 : vector<1x32xf32> to vector<16x32xf32>
    %59 = arith.addf %56, %58 : vector<16x32xf32>
    %60 = math.tanh %59 : vector<16x32xf32>
    %c0_42 = arith.constant 0 : index
    %c0_43 = arith.constant 0 : index
    %61 = vector.load %arg13[%c0_42, %c0_43] : memref<32x1xf32, #tpu.memory_space<vmem>>, vector<32x1xf32>
    %cst_44 = arith.constant dense<0.000000e+00> : vector<16x1xf32>
    %62 = tpu.matmul %60, %61, %cst_44 {dimension_numbers = #tpu.dot_dimension_numbers<[1], [0], [0], [1], [0, 0, 1, 1], [], []>} : vector<16x32xf32>, vector<32x1xf32>, vector<16x1xf32> -> vector<16x1xf32>
    %c0_45 = arith.constant 0 : index
    %c0_46 = arith.constant 0 : index
    %63 = vector.load %arg14[%c0_45, %c0_46] : memref<1x1xf32, #tpu.memory_space<vmem>>, vector<1x1xf32>
    %64 = vector.broadcast %63 : vector<1x1xf32> to vector<16x1xf32>
    %65 = arith.addf %62, %64 : vector<16x1xf32>
    %cst_47 = arith.constant 1.000000e+01 : f32
    %66 = vector.broadcast %cst_47 : f32 to vector<16x1xf32>
    %67 = arith.mulf %65, %66 : vector<16x1xf32>
    %68 = vector.broadcast %67 : vector<16x1xf32> to vector<16x8xf32>
    %69 = arith.mulf %68, %36 : vector<16x8xf32>
    %cst_48 = arith.constant dense<0.000000e+00> : vector<2x8xf32>
    %70 = tpu.matmul %34, %69, %cst_48 {dimension_numbers = #tpu.dot_dimension_numbers<[1], [0], [0], [1], [0, 0, 1, 1], [], []>} : vector<2x16xf32>, vector<16x8xf32>, vector<2x8xf32> -> vector<2x8xf32>
    %c0_49 = arith.constant 0 : index
    %c0_50 = arith.constant 0 : index
    %71 = vector.load %arg3[%c0_49, %c0_50] : memref<2x8xf32, #tpu.memory_space<vmem>>, vector<2x8xf32>
    %cst_51 = arith.constant 5.000000e-01 : f32
    %72 = vector.broadcast %cst_51 : f32 to vector<2x8xf32>
    %73 = arith.cmpf ogt, %71, %72 : vector<2x8xf32>
    %cst_52 = arith.constant -1.000000e+30 : f32
    %74 = vector.broadcast %cst_52 : f32 to vector<2x8xf32>
    %75 = arith.select %73, %74, %70 : vector<2x8xi1>, vector<2x8xf32>
    %cst_53 = arith.constant dense<0xFF800000> : vector<2xf32>
    %76 = vector.multi_reduction <maximumf>, %75, %cst_53 [1] : vector<2x8xf32> to vector<2xf32>
    %77 = vector.shape_cast %76 : vector<2xf32> to vector<2x1xf32>
    %78 = vector.broadcast %77 : vector<2x1xf32> to vector<2x8xf32>
    %79 = arith.subf %75, %78 : vector<2x8xf32>
    %80 = math.exp %79 : vector<2x8xf32>
    %cst_54 = arith.constant dense<0.000000e+00> : vector<2xf32>
    %81 = vector.multi_reduction <add>, %80, %cst_54 [1] : vector<2x8xf32> to vector<2xf32>
    %82 = vector.shape_cast %81 : vector<2xf32> to vector<2x1xf32>
    %83 = vector.broadcast %82 : vector<2x1xf32> to vector<2x8xf32>
    %84 = arith.divf %80, %83 : vector<2x8xf32>
    %c0_55 = arith.constant 0 : index
    %c0_56 = arith.constant 0 : index
    %85 = vector.load %arg18[%c0_55, %c0_56] : memref<2x8xf32, #tpu.memory_space<vmem>>, vector<2x8xf32>
    tpu.vector_store %arg18[%c0_55, %c0_56], %84 {strides = array<i32>} : memref<2x8xf32, #tpu.memory_space<vmem>>, vector<2x8xf32>,
    return
  }
}

</mosaic_0001>

<bundles_post_ra>
// kernel: tpu_custom_call.1
= control target key start
LH: loop header
LB: loop body
LE: loop exit
PB: predicated region body
PF: predicated region fallthrough
CT: control target
= control target key end

     0   :  { %s1546_s0 = inlined_call_operand.vmem [shape: f32[16,1], index: 0, kind: input, shape index: {}]   ;;  %s1547_s1 = inlined_call_operand.vmem [shape: f32[16,1], index: 1, kind: input, shape index: {}]   ;;  %s1548_s2 = inlined_call_operand.vmem [shape: f32[2,32], index: 2, kind: input, shape index: {}]   ;;  %s1549_s3 = inlined_call_operand.hbm [shape: f32[2,8], index: 3, kind: input, shape index: {}]   ;;  %s1550_s4 = inlined_call_operand.hbm [shape: f32[2,32], index: 4, kind: input, shape index: {}]   ;;  %s1551_s5 = inlined_call_operand.vmem [shape: f32[1,32], index: 5, kind: input, shape index: {}]   ;;  %s1552_s6 = inlined_call_operand.hbm [shape: f32[1,32], index: 6, kind: input, shape index: {}]   ;;  %s1553_s7 = inlined_call_operand.vmem [shape: f32[32,32], index: 7, kind: input, shape index: {}]   ;;  %s1554_s8 = inlined_call_operand.vmem [shape: f32[32,32], index: 8, kind: input, shape index: {}]   ;;  %s1555_s9 = inlined_call_operand.vmem [shape: f32[32,32], index: 9, kind: input, shape index: {}]   ;;  %s1556_s10 = inlined_call_operand.vmem [shape: f32[1,32], index: 10, kind: input, shape index: {}]   ;;  %s1557_s11 = inlined_call_operand.vmem [shape: f32[32,32], index: 11, kind: input, shape index: {}]   ;;  %s1558_s12 = inlined_call_operand.vmem [shape: f32[1,32], index: 12, kind: input, shape index: {}]   ;;  %s1559_s13 = inlined_call_operand.vmem [shape: f32[32,1], index: 13, kind: input, shape index: {}]   ;;  %s1560_s14 = inlined_call_operand.<no memory space> [shape: f32[1,1], index: 14, kind: input, shape index: {}]   ;;  %s1561_s15 = inlined_call_operand.vmem [shape: f32[2,16], index: 15, kind: input, shape index: {}]   ;;  %s1562_s16 = inlined_call_operand.vmem [shape: f32[16,2], index: 16, kind: input, shape index: {}]   ;;  %s1563_s17 = inlined_call_operand.vmem [shape: f32[16,8], index: 17, kind: input, shape index: {}]   ;;  %s1564_s18 = inlined_call_operand.hbm [shape: f32[2,8], index: 18, kind: output, shape index: {0}]   ;;  %s1565_s19 = inlined_call_operand.hbm [shape: f32[2,32], index: 19, kind: output, shape index: {1}]  }
   0x1   :  { %1569 = sst [smem:[#allocation16_spill]] %s1546_s0  ;;  %v25_v0 = vstv %s1560_s14 }
   0x2   :  { %1570 = sst [smem:[#allocation17_spill]] %s1547_s1  ;;  %26 = vst [vmem:[#allocation2] sm:$0x1] %v25_v0 }
   0x3   :  { %1571 = sst [smem:[#allocation18_spill]] %s1548_s2 }
   0x4   :  { %1572 = sst [smem:[#allocation19_spill]] %s1549_s3 }
   0x5   :  { %27 = vsyncpa [#allocation4], 0 }
   0x6   :  { %28 = vsyncpa [#allocation7], 0 }
   0x7   :  { %29 = vsyncpa [#allocation5], 0 }
   0x8   :  { %30 = vsyncpa [#allocation11], 0  ;;  %s1240_s20 = smov [#allocation6]   ;;  %s1241_s1 = smov [#allocation3]  }
   0x9   :  { %s53_s21 = sshll.u32 %s1240_s20, 4  ;;  %s43_s22 = sshll.u32 %s1241_s1, 4  ;;  %s54_s21 = int_to_ptr.vmem [resolvable:$true] %s53_s21  ;;  %s44_s22 = int_to_ptr.vmem [resolvable:$true] %s43_s22 }
   0xa   :  { %s1122_s24 = scalar_lea.hbm %s1550_s4, 32 }
   0xb   :  { %p1123_p0 = scmp.ne.s32.totalorder %s1550_s4, %s1122_s24  ;;  %p1126_p1 = scmp.lt.u32.totalorder %s1122_s24, %s1550_s4 }
   0xd   :  { %p1128_p2 = pnand %p1126_p1, %p1123_p0 }
   0xf   :  { %1131 = shalt.err (!%p1128_p2)
}
  0x10   :  { %s1132_s27 = scalar_lea.vmem %s54_s21, 32  ;;  %p1137_p4 = scmp.lt.s32.totalorder %s54_s21, %s54_s21 }
  0x11   :  { %p1133_p3 = scmp.ne.s32.totalorder %s54_s21, %s1132_s27  ;;  %p1138_p5 = scmp.lt.s32.totalorder %s1132_s27, %s1132_s27 }
  0x13   :  { %p1139_p6 = por %p1138_p5, %p1137_p4 }
  0x15   :  { %p1140_p7 = pnand %p1139_p6, %p1133_p3 }
  0x17   :  { %1143 = shalt.err (!%p1140_p7)
}
  0x18   :  { %56 = dma.hbm_to_vmem [thread:$0]  %s1550_s4, 32, %s54_s21, [#allocation7]  }
  0x19   :  { %s1573_s20 = sld [smem:[#allocation19_spill]] }
  0x1f   :  { %s1144_s1 = scalar_lea.hbm %s1573_s20, 32 }
  0x20   :  { %p1145_p8 = scmp.ne.s32.totalorder %s1573_s20, %s1144_s1  ;;  %p1148_p9 = scmp.lt.u32.totalorder %s1144_s1, %s1573_s20 }
  0x22   :  { %p1150_p10 = pnand %p1148_p9, %p1145_p8 }
  0x24   :  { %1153 = shalt.err (!%p1150_p10)
}
  0x25   :  { %s1154_s3 = scalar_lea.vmem %s44_s22, 32  ;;  %p1159_p12 = scmp.lt.s32.totalorder %s44_s22, %s44_s22 }
  0x26   :  { %p1155_p11 = scmp.ne.s32.totalorder %s44_s22, %s1154_s3  ;;  %p1160_p13 = scmp.lt.s32.totalorder %s1154_s3, %s1154_s3 }
  0x28   :  { %p1161_p0 = por %p1160_p13, %p1159_p12 }
  0x2a   :  { %p1162_p1 = pnand %p1161_p0, %p1155_p11 }
  0x2c   :  { %1165 = shalt.err (!%p1162_p1)
}
  0x2d   :  { %46 = dma.hbm_to_vmem [thread:$0]  %s1573_s20, 32, %s44_s22, [#allocation4]  }
  0x2e   :  { %s1242_s14 = smov [#allocation8]   ;;  %s1166_s29 = scalar_lea.hbm %s1552_s6, 16 }
  0x2f   :  { %s65_s26 = sshll.u32 %s1242_s14, 4  ;;  %p1167_p2 = scmp.ne.s32.totalorder %s1552_s6, %s1166_s29  ;;  %s66_s26 = int_to_ptr.vmem [resolvable:$true] %s65_s26 }
  0x30   :  { %p1170_p3 = scmp.lt.u32.totalorder %s1166_s29, %s1552_s6 }
  0x32   :  { %p1172_p4 = pnand %p1170_p3, %p1167_p2 }
  0x34   :  { %1175 = shalt.err (!%p1172_p4)
}
  0x35   :  { %s1176_s23 = scalar_lea.vmem %s66_s26, 16  ;;  %s1180_s22 = scalar_lea.vmem %s66_s26, 32 }
  0x36   :  { %p1177_p5 = scmp.ne.s32.totalorder %s66_s26, %s1176_s23  ;;  %p1181_p6 = scmp.lt.s32.totalorder %s66_s26, %s66_s26 }
  0x37   :  { %p1182_p7 = scmp.lt.s32.totalorder %s1180_s22, %s1176_s23 }
  0x39   :  { %p1183_p8 = por %p1182_p7, %p1181_p6 }
  0x3b   :  { %p1184_p9 = pnand %p1183_p8, %p1177_p5 }
  0x3d   :  { %1187 = shalt.err (!%p1184_p9)
}
  0x3e   :  { %68 = dma.hbm_to_vmem [thread:$0]  %s1552_s6, 16, %s66_s26, [#allocation7]  }
  0x3f   :  { %1232 = dma.done.wait [#allocation4], 32  }
  0x40   :  { %1233 = vsyncadd [#allocation4], 4294967264 }
  0x41   :  { %1234 = dma.done.wait [#allocation7], 48  }
  0x42   :  { %1235 = vsyncadd [#allocation7], 4294967248  ;;  %v1243_v1 = vmov 0   ;;  %s1574_s4 = sld [smem:[#allocation17_spill]]  ;;  %s1575_s27 = sld [smem:[#allocation16_spill]]  ;;  %v1244_v6 = vmov 0.0|0.0   ;;  %v113_v18 = vlaneseq }
  0x43   :  { %1107 = vset.pattern.permute.xlu1 %v1243_v1  ;;  %1106 = vset.pattern.permute.xlu0 %v1243_v1  ;;  %vm1245_vm0 = vmmov 0   ;;  %v1246_v7 = vmov 0.0   ;;  %v274_v8 = vld [vmem:[%s1555_s9] sm:$0xff]  ;;  %v275_v9 = vld [vmem:[%s1555_s9 + $0x8] sm:$0xff]  ;;  %v276_v10 = vld [vmem:[%s1555_s9 + $0x10] sm:$0xff]  ;;  %s1576_s28 = sld [smem:[#allocation18_spill]] }
  0x44   :  { %1051 = vmatprep.subr.bf16.mxu0 %v1244_v6  ;;  %1054 = vmatprep.subr.bf16.mxu1 %v1244_v6  ;;  %v1055_v11 = vpack.c.bf16 %v275_v9, %v274_v8  ;;  %v277_v12 = vld [vmem:[%s1555_s9 + $0x18] sm:$0xff]  ;;  %v269_v14 = vld [vmem:[%s1554_s8] sm:$0xff]  ;;  %v270_v15 = vld [vmem:[%s1554_s8 + $0x8] sm:$0xff]  ;;  %vm139_vm1 = vcmask 261120   ;;  %v114_v19 = vshrl.u32 %v113_v18, 7  ;;  %vm192_vm2 = vcmask 130048  }
  0x45   :  { %981 = vmatprep.mubr.msk.f32.mxu0 %vm1245_vm0, %v1246_v7  ;;  %992 = vmatprep.mubr.msk.f32.mxu1 %vm1245_vm0, %v1246_v7  ;;  %v1058_v13 = vpack.c.bf16 %v277_v12, %v276_v10  ;;  %v1061_v17 = vpack.c.bf16 %v270_v15, %v269_v14  ;;  %v100_v22 = vld [vmem:[#allocation6] sm:$0x3]  ;;  %v922_v61 = vld [vmem:[%s1551_s5] ss:$0 sm:$0xff]  ;;  %v923_v0 = vld [vmem:[#allocation8] ss:$0 sm:$0xff] }
  0x46   :  { %1056 = vmatpush3.bf16.msra.mxu1 %v1055_v11  ;;  %v133_v20 = vsub.s32 1, %v114_v19  ;;  %v115_v21 = vsub.s32 0, %v114_v19  ;;  %v1443_v8 = vld [vmem:[%s1561_s15] sm:$0x3]  ;;  %v271_v9 = vld [vmem:[%s1554_s8 + $0x10] sm:$0xff]  ;;  %v272_v10 = vld [vmem:[%s1554_s8 + $0x18] sm:$0xff] }
  0x47   :  { %1057 = vmatprep.subr.bf16.mxu1 %v1244_v6  ;;  %v1064_v11 = vpack.c.bf16 %v272_v10, %v271_v9  ;;  %vm267_vm3 = vcmask 254976   ;;  %v188_v15 = vld [vmem:[%s1562_s16] sm:$0xff]  ;;  %vm428_vm4 = vcmask 15360   ;;  %vm435_vm5 = vcmask 1041408   ;;  %v426_v18 = vld [vmem:[%s1553_s7 + $0x10] sm:$0xff]  ;;  %v427_v19 = vld [vmem:[%s1553_s7 + $0x18] sm:$0xff] }
  0x48   :  { %v119_v2 = vld [vmem:[%s1574_s4] sm:$0xff]  ;;  %v120_v4 = vld [vmem:[%s1574_s4 + $0x8] sm:$0xff]  ;;  %v134_v23 = vrot.slane %v100_v22, %v133_v20  ;;  %v116_v24 = vrot.slane %v100_v22, %v115_v21  ;;  %vm879_vm7 = vcmask 58368  }
  0x49   :  { %v101_v3 = vld [vmem:[%s1575_s27] sm:$0xff]  ;;  %123 = vperm.xlu1 %1107, %v119_v2   ;;  %v102_v5 = vld [vmem:[%s1575_s27 + $0x8] sm:$0xff] }
  0x4a   :  { %105 = vperm.xlu0 %1106, %v101_v3   ;;  %1059 = vmatpush3.bf16.msra.mxu1 %v1058_v13  ;;  %v273_v16 = vld [vmem:[%s1576_s28] sm:$0x3]  ;;  %v189_v22 = vld [vmem:[%s1562_s16 + $0x8] sm:$0xff] }
  0x4b   :  { %1060 = vmatprep.subr.bf16.mxu1 %v1244_v6 }
  0x4d   :  { %128 = vperm.xlu1 %1107, %v120_v4   ;;  %993 = vmatmul.mubr.msk.f32.vlgmr.msra.gmra.mrb[0].mxu1 %vm139_vm1, %v273_v16  ;;  %v424_v16 = vld [vmem:[%s1553_s7] sm:$0xff] }
  0x4e   :  { %110 = vperm.xlu0 %1106, %v102_v5   ;;  %1062 = vmatpush3.bf16.msra.mxu1 %v1061_v17  ;;  %v425_v17 = vld [vmem:[%s1553_s7 + $0x8] sm:$0xff] }
  0x4f   :  { %1003 = vmatprep.mubr.msk.f32.mxu1 %vm1245_vm0, %v1246_v7  ;;  %1063 = vmatprep.subr.bf16.mxu1 %v1244_v6  ;;  %v1066_v20 = vpack.c.bf16 %v425_v17, %v424_v16 }
  0x52   :  { %1065 = vmatpush3.bf16.msra.mxu1 %v1064_v11 }
  0xc8   :  { %v124_v25 = vpop.permute.xlu1 %123 }
  0xc9   :  { %v106_v26 = vpop.permute.xlu0 %105  ;;  %v135_v27 = vmul.f32 %v134_v23, %v124_v25  ;;  %v606_v25 = vld [vmem:[%s1557_s11] sm:$0xff] }
  0xca   :  { %v117_v28 = vmul.f32 %v116_v24, %v106_v26  ;;  %v607_v26 = vld [vmem:[%s1557_s11 + $0x8] sm:$0xff] }
  0xcc   :  { %v129_v29 = vpop.permute.xlu1 %128  ;;  %v137_v31 = vadd.f32 %v135_v27, %v117_v28  ;;  %v608_v27 = vld [vmem:[%s1557_s11 + $0x10] sm:$0xff]  ;;  %v1074_v28 = vpack.c.bf16 %v607_v26, %v606_v25 }
  0xcd   :  { %v111_v30 = vpop.permute.xlu0 %110  ;;  %v136_v32 = vmul.f32 %v134_v23, %v129_v29  ;;  %v609_v29 = vld [vmem:[%s1557_s11 + $0x18] sm:$0xff] }
  0xce   :  { %v118_v33 = vmul.f32 %v116_v24, %v111_v30  ;;  %v140_v35 = vsel %vm139_vm1, %v137_v31, 0.0  ;;  %v1070_v24 = vpack.c.bf16 %v427_v19, %v426_v18  ;;  %v1078_v30 = vpack.c.bf16 %v609_v29, %v608_v27 }
  0xd0   :  { %v138_v34 = vadd.f32 %v136_v32, %v118_v33 }
  0xd2   :  { %v141_v36 = vsel %vm139_vm1, %v138_v34, 0.0 }
  0xd3   :  { %v142_v37 = vadd.f32 %v141_v36, %v140_v35 }
  0xd5   :  { %v143_v38 = vrot.slane %v142_v37, 4 }
  0xd7   :  { %v144_v39 = vadd.f32 %v143_v38, %v142_v37  ;;  %v701_v38 = vld [vmem:[%s1559_s13 + $0x8] sm:$0xff] }
  0xd9   :  { %v145_v40 = vrot.slane %v144_v39, 2 }
  0xdb   :  { %v146_v41 = vadd.f32 %v145_v40, %v144_v39  ;;  %v702_v39 = vld [vmem:[%s1559_s13 + $0x10] sm:$0xff] }
  0xdd   :  { %v147_v42 = vrot.slane %v146_v41, 1 }
  0xdf   :  { %v148_v43 = vadd.f32 %v147_v42, %v146_v41  ;;  %v703_v41 = vld [vmem:[%s1559_s13 + $0x18] sm:$0xff] }
  0xe0   :  { %v1086_v42 = vpack.c.bf16 %v703_v41, %v702_v39 }
  0xe1   :  { %v150_v44 = vmul.f32 0.0625, %v148_v43 }
  0xe3   :  { %v151_v45 = vsub.f32 %v137_v31, %v150_v44  ;;  %v152_v46 = vsub.f32 %v138_v34, %v150_v44  ;;  %v932_v31 = vld [vmem:[%s1556_s10] ss:$0 sm:$0xff] }
  0xe5   :  { %v153_v47 = vmul.f32 %v151_v45, %v151_v45  ;;  %v154_v48 = vmul.f32 %v152_v46, %v152_v46 }
  0xe7   :  { %v155_v49 = vsel %vm139_vm1, %v153_v47, 0.0  ;;  %v156_v50 = vsel %vm139_vm1, %v154_v48, 0.0 }
  0xe8   :  { %v157_v51 = vadd.f32 %v156_v50, %v155_v49  ;;  %v936_v49 = vld [vmem:[#allocation2] ss:$0 sm:$0xff] }
  0xea   :  { %v158_v52 = vrot.slane %v157_v51, 4 }
  0xec   :  { %v159_v53 = vadd.f32 %v158_v52, %v157_v51 }
  0xee   :  { %v160_v54 = vrot.slane %v159_v53, 2 }
  0xf0   :  { %v161_v55 = vadd.f32 %v160_v54, %v159_v53 }
  0xf2   :  { %v162_v56 = vrot.slane %v161_v55, 1 }
  0xf4   :  { %v163_v57 = vadd.f32 %v162_v56, %v161_v55  ;;  %v191_v56 = vld [vmem:[%s1563_s17 + $0x8] sm:$0xff] }
  0xf6   :  { %v164_v58 = vmul.f32 0.0625, %v163_v57  ;;  %v190_v57 = vld [vmem:[%s1563_s17] sm:$0xff]  ;;  %s1247_s17 = smov [#allocation10]  }
  0xf7   :  { %s908_s3 = sshll.u32 %s1247_s17, 4  ;;  %s909_s3 = int_to_ptr.vmem [resolvable:$true] %s908_s3 }
  0xf8   :  { %v165_v59 = vadd.f32 1e-05, %v164_v58  ;;  %s1188_s4 = scalar_lea.vmem %s909_s3, 32  ;;  %p1193_p11 = scmp.lt.s32.totalorder %s909_s3, %s909_s3 }
  0xf9   :  { %p1189_p10 = scmp.ne.s32.totalorder %s909_s3, %s1188_s4  ;;  %p1194_p12 = scmp.lt.s32.totalorder %s1188_s4, %s1188_s4 }
  0xfa   :  { %1108 = vrsqrt.f32 %v165_v59 }
  0xfb   :  { %p1195_p13 = por %p1194_p12, %p1193_p11 }
  0xfd   :  { %p1196_p0 = pnand %p1195_p13, %p1189_p10 }
 0x104   :  { %v1109_v60 = vpop.eup %1108 }
 0x105   :  { %v168_v62 = vmul.f32 %v1109_v60, %v152_v46  ;;  %v167_v63 = vmul.f32 %v1109_v60, %v151_v45 }
 0x107   :  { %v176_v1 = vmul.f32 %v922_v61, %v167_v63  ;;  %v177_v2 = vmul.f32 %v922_v61, %v168_v62  ;;  %v876_v63 = vld [vmem:[#allocation3] sm:$0x3] }
 0x108   :  { %vm877_vm6 = vcmp.gt.f32.partialorder %v876_v63, 0.5 }
 0x109   :  { %v185_v3 = vadd.f32 %v923_v0, %v176_v1  ;;  %v186_v4 = vadd.f32 %v923_v0, %v177_v2 }
 0x10b   :  { %v1052_v5 = vpack.c.bf16 %v186_v4, %v185_v3 }
 0x10d   :  { %1053 = vmatpush3.bf16.msra.mxu0 %v1052_v5 }
 0x110   :  { %982 = vmatmul.mubr.msk.f32.vlgmr.msra.gmra.mrb[0].mxu0 %vm192_vm2, %v1443_v8 }
 0x111   :  { %1008 = vmatprep.mubr.msk.f32.mxu0 %vm428_vm4, %v188_v15 }
 0x1e3   :  { %v262_v12 = vpop.f32.mrb[0].mxu0 }
 0x1e4   :  { %v266_v13 = vmul.f32 0.125, %v262_v12  ;;  %v983_v14 = vpop.f32.mrb[1].mxu0 }
 0x1e6   :  { %1004 = vmatmul.mubr.msk.f32.vlgmr.msra.gmra.mrb[0].mxu1 %vm139_vm1, %v266_v13  ;;  %268 = vst.msk [vmem:[#allocation10] sm:$0x3] %vm267_vm3, %v266_v13 }
 0x2b9   :  { %v420_v21 = vpop.f32.mrb[0].mxu1 }
 0x2ba   :  { %v1005_v23 = vpop.f32.mrb[1].mxu1  ;;  %1006 = vmatprep.subr.msk.mxu0 %vm435_vm5, %v420_v21 }
 0x2bb   :  { %1007 = vmatpush3.msk.msra.mxu0 %vm435_vm5, %v420_v21 }
 0x2bc   :  { %1009 = vmatmul.mubr.msk.f32.vlgmr.msra.gmra.mrb[2].mxu0 %vm428_vm4, %v189_v22  ;;  %1067 = vmatprep.subr.bf16.mxu0 %v1066_v20 }
 0x2bd   :  { %1069 = vmatpush3.bf16.msra.mxu0 %v1066_v20  ;;  %1019 = vmatprep.mubr.msk.f32.mxu0 %vm139_vm1, %v185_v3 }
 0x2be   :  { %1071 = vmatprep.subr.bf16.mxu0 %v1070_v24 }
 0x2c1   :  { %1073 = vmatpush3.bf16.msra.mxu0 %v1070_v24 }
 0x2c2   :  { %1075 = vmatprep.subr.bf16.mxu0 %v1074_v28 }
 0x2c4   :  { %1020 = vmatmul.mubr.msk.f32.vlgmr.msra.gmra.mrb[2].mxu0 %vm139_vm1, %v186_v4 }
 0x2c5   :  { %1077 = vmatpush3.bf16.msra.mxu0 %v1074_v28 }
 0x2c6   :  { %1079 = vmatprep.subr.bf16.mxu0 %v1078_v30 }
 0x2c9   :  { %1081 = vmatpush3.bf16.msra.mxu0 %v1078_v30 }
 0x2ca   :  { %1090 = vmatprep.subr.bf16.mxu0 %v1244_v6  ;;  %v700_v6 = vld [vmem:[%s1559_s13] sm:$0xff] }
 0x2cb   :  { %v1082_v40 = vpack.c.bf16 %v701_v38, %v700_v6 }
 0x2cd   :  { %1083 = vmatprep.subr.bf16.mxu1 %v1082_v40 }
 0x2ce   :  { %1085 = vmatpush3.bf16.msra.mxu1 %v1082_v40 }
 0x2cf   :  { %1087 = vmatprep.subr.bf16.mxu1 %v1086_v42 }
 0x2d2   :  { %1089 = vmatpush3.bf16.msra.mxu1 %v1086_v42 }
 0x397   :  { %v1021_v32 = vpop.f32.mrb[2].mxu0 }
 0x398   :  { %v603_v33 = vadd.f32 %v1021_v32, %v932_v31  ;;  %v586_v34 = vpop.f32.mrb[3].mxu0 }
 0x399   :  { %v602_v35 = vadd.f32 %v932_v31, %v586_v34 }
 0x39b   :  { %1110 = vtanh.f32 %v602_v35 }
 0x39c   :  { %1112 = vtanh.f32 %v603_v33 }
 0x3a5   :  { %v1111_v36 = vpop.eup %1110 }
 0x3a6   :  { %v1113_v37 = vpop.eup %1112  ;;  %1030 = vmatprep.mubr.msk.f32.mxu0 %vm139_vm1, %v1111_v36 }
 0x3a7   :  { %1031 = vmatmul.mubr.msk.f32.vlgmr.msra.gmra.mrb[4].mxu0 %vm139_vm1, %v1113_v37 }
 0x3a8   :  { %1048 = vmatprep.mubr.msk.f32.mxu0 %vm1245_vm0, %v1246_v7  ;;  %v933_v7 = vld [vmem:[%s1558_s12] ss:$0 sm:$0xff] }
 0x47a   :  { %v1032_v43 = vpop.f32.mrb[4].mxu0 }
 0x47b   :  { %v695_v44 = vadd.f32 %v1032_v43, %v933_v7  ;;  %v689_v45 = vpop.f32.mrb[5].mxu0 }
 0x47c   :  { %v690_v46 = vadd.f32 %v933_v7, %v689_v45 }
 0x47e   :  { %1114 = vtanh.f32 %v690_v46 }
 0x47f   :  { %1116 = vtanh.f32 %v695_v44 }
 0x488   :  { %v1115_v47 = vpop.eup %1114 }
 0x489   :  { %v1117_v48 = vpop.eup %1116  ;;  %1041 = vmatprep.mubr.msk.f32.mxu1 %vm139_vm1, %v1115_v47 }
 0x48a   :  { %1042 = vmatmul.mubr.msk.f32.vlgmr.msra.gmra.mrb[2].mxu1 %vm139_vm1, %v1117_v48 }
 0x55d   :  { %v1043_v50 = vpop.f32.mrb[2].mxu1 }
 0x55e   :  { %v789_v51 = vadd.f32 %v1043_v50, %v936_v49  ;;  %v783_v52 = vpop.f32.mrb[3].mxu1 }
 0x55f   :  { %v784_v53 = vadd.f32 %v936_v49, %v783_v52 }
 0x560   :  { %v793_v54 = vmul.f32 10.0, %v789_v51 }
 0x561   :  { %v792_v55 = vmul.f32 10.0, %v784_v53 }
 0x562   :  { %801 = vperm.xlu1 %1107, %v793_v54  }
 0x563   :  { %796 = vperm.xlu0 %1106, %v792_v55  }
 0x5e1   :  { %v802_v58 = vpop.permute.xlu1 %801 }
 0x5e2   :  { %v805_v59 = vmul.f32 %v802_v58, %v191_v56  ;;  %v797_v60 = vpop.permute.xlu0 %796 }
 0x5e3   :  { %v804_v61 = vmul.f32 %v797_v60, %v190_v57 }
 0x5e5   :  { %v1091_v62 = vpack.c.bf16 %v805_v59, %v804_v61 }
 0x5e7   :  { %1092 = vmatpush3.bf16.msra.mxu0 %v1091_v62 }
 0x5ea   :  { %1049 = vmatmul.mubr.msk.f32.vlgmr.msra.gmra.mrb[6].mxu0 %vm192_vm2, %v1443_v8 }
 0x6bd   :  { %v872_v0 = vpop.f32.mrb[6].mxu0 }
 0x6be   :  { %v878_v1 = vsel %vm877_vm6, -1e+30, %v872_v0  ;;  %v1050_v2 = vpop.f32.mrb[7].mxu0 }
 0x6bf   :  { %v880_v3 = vsel %vm879_vm7, %v878_v1, -inf }
 0x6c0   :  { %881 = vmax.xlane.f32.xlu0 %v880_v3 }
 0x74d   :  { %v882_v4 = vpop.xlane.xlu0 %881 }
 0x74e   :  { %v883_v5 = vsub.f32 %v878_v1, %v882_v4 }
 0x750   :  { %v884_v9 = vmul.f32 1.442695, %v883_v5 }
 0x752   :  { %1118 = vpow2.f32 %v884_v9 }
 0x75c   :  { %v1119_v10 = vpop.eup %1118 }
 0x75d   :  { %v886_v11 = vsel %vm879_vm7, %v1119_v10, 0.0 }
 0x75e   :  { %887 = vadd.xlane.f32.xlu1 %v886_v11 }
 0x75f   :  { %1199 = shalt.err (!%p1196_p0)
}
 0x760   :  { %s1200_s7 = scalar_lea.hbm %s1565_s19, 32 }
 0x761   :  { %p1201_p1 = scmp.ne.s32.totalorder %s1565_s19, %s1200_s7  ;;  %p1204_p2 = scmp.lt.u32.totalorder %s1200_s7, %s1565_s19 }
 0x763   :  { %p1206_p3 = pnand %p1204_p2, %p1201_p1 }
 0x765   :  { %1209 = shalt.err (!%p1206_p3)
}
 0x766   :  { %911 = dma.vmem_to_hbm [thread:$0]  %s909_s3, 32, %s1565_s19, [#allocation11]  }
 0x767   :  { %s1248_s26 = smov [#allocation9]  }
 0x768   :  { %s898_s0 = sshll.u32 %s1248_s26, 4  ;;  %s899_s0 = int_to_ptr.vmem [resolvable:$true] %s898_s0 }
 0x769   :  { %s1210_s5 = scalar_lea.vmem %s899_s0, 32  ;;  %p1215_p5 = scmp.lt.s32.totalorder %s899_s0, %s899_s0 }
 0x76a   :  { %p1211_p4 = scmp.ne.s32.totalorder %s899_s0, %s1210_s5  ;;  %p1216_p6 = scmp.lt.s32.totalorder %s1210_s5, %s1210_s5 }
 0x76c   :  { %p1217_p7 = por %p1216_p6, %p1215_p5 }
 0x76e   :  { %p1218_p8 = pnand %p1217_p7, %p1211_p4 }
 0x7eb   :  { %v888_v8 = vpop.xlane.xlu1 %887 }
 0x7ec   :  { %1120 = vrcp.f32 %v888_v8 }
 0x7f6   :  { %v1121_v12 = vpop.eup %1120 }
 0x7f7   :  { %v890_v13 = vmul.f32 %v1121_v12, %v1119_v10 }
 0x7f9   :  { %891 = vst.msk [vmem:[#allocation9] sm:$0x3] %vm879_vm7, %v890_v13 }
 0x7fa   :  { %1221 = shalt.err (!%p1218_p8)
}
 0x7fb   :  { %s1222_s19 = scalar_lea.hbm %s1564_s18, 32 }
 0x7fc   :  { %p1223_p9 = scmp.ne.s32.totalorder %s1564_s18, %s1222_s19  ;;  %p1226_p10 = scmp.lt.u32.totalorder %s1222_s19, %s1564_s18 }
 0x7fe   :  { %p1228_p11 = pnand %p1226_p10, %p1223_p9 }
 0x800   :  { %1231 = shalt.err (!%p1228_p11)
}
 0x801   :  { %901 = dma.vmem_to_hbm [thread:$0]  %s899_s0, 32, %s1564_s18, [#allocation5]  }
 0x802   :  { %1236 = dma.done.wait [#allocation5], 32  }
 0x803   :  { %1237 = vsyncadd [#allocation5], 4294967264 }
 0x804   :  { %1238 = dma.done.wait [#allocation11], 32  }
 0x805   :  { %1239 = vsyncadd [#allocation11], 4294967264 }
 0x806   :  { %918 = vsyncpa [#allocation4], 1 }
 0x807   :  { %919 = vsyncpa [#allocation7], 1 }
 0x808   :  { %920 = vsyncpa [#allocation5], 1 }
 0x809   :  { %921 = vsyncpa [#allocation11], 1 }

</bundles_post_ra>
